<compile_context>
chip_gen: v5e
topology: v5e:2x2
jax: 0.10.0
libtpu: 0.0.40
codegen_flags: <defaults>
</compile_context>

<pallas_src>
import functools

import jax
import jax.numpy as jnp
import numpy as np
from jax.experimental import pallas as pl
from jax.experimental.pallas import tpu as pltpu


_MIN_GRID_STEPS = 8      # >= 2 v7x cores x 2 buffers x 2: keeps pipeline/megacore busy
_MAX_ROW_TILE = 8192     # bounds per-step epilogue relayout / store work


def _round_up(v: int, m: int) -> int:
    return ((v + m - 1) // m) * m


def _cdiv(a: int, b: int) -> int:
    return -(-a // b)


def _tuning():
    """(target_tile_bytes per buffer, vmem_limit_bytes) tuned per TPU generation."""
    kind = ""
    try:
        dev = jax.devices()[0]
        if dev.platform == "tpu":
            kind = dev.device_kind.lower()
    except Exception:
        pass
    if "v6" in kind:                      # 128 MiB VMEM, ~1.4 TB/s HBM
        return 12 << 20, 64 << 20
    if "v7" in kind or "7x" in kind:      # 64 MiB VMEM / TC, ~3.2 TB/s HBM
        return 8 << 20, 48 << 20
    if "v5" in kind:                      # v5e/v5p (16 MiB scoped default)
        return 8 << 20, 40 << 20
    return 4 << 20, 32 << 20              # unknown / older: conservative


def _sublane(dtype) -> int:
    """Native sublane packing: 8 rows for 4-byte, 16 for 2-byte, 32 for 1-byte."""
    itemsize = jnp.dtype(dtype).itemsize
    return 8 * max(1, 4 // itemsize)


# ---------------------------------------------------------------------------
# Kernels: each row of the (r_tile, HW) block is one (n, c) pair; reduce lanes.
# The HW axis is never tiled, so every in-bounds row is fully valid; garbage
# rows of the final partial block are either masked on store (fallback layout)
# or sliced away in the wrapper (lane-dense layout).
# ---------------------------------------------------------------------------
def _store_pooled(red, o_ref):
    """Write a (r_tile, 1) float32 reduce result into the output block."""
    if o_ref.shape[-1] == 1:
        # Fallback layout: (r_tile, 1) block (lane-padded in VMEM, masked stores).
        o_ref[...] = red.astype(o_ref.dtype)
    else:
        # Lane-dense layout: (1, 1, r_tile) block.  The sublane->lane relayout
        # runs on the XLU, which has full slack in this HBM-bound kernel.
        o_ref[...] = jnp.transpose(red)[None].astype(o_ref.dtype)


def _avg_kernel(x_ref, o_ref):
    x = x_ref[...].astype(jnp.float32)
    _store_pooled(jnp.mean(x, axis=-1, keepdims=True), o_ref)


def _max_kernel(x_ref, o_ref):
    x = x_ref[...].astype(jnp.float32)
    _store_pooled(jnp.max(x, axis=-1, keepdims=True), o_ref)


def _avgmax_kernel(x_ref, o_ref):
    x = x_ref[...].astype(jnp.float32)
    avg = jnp.mean(x, axis=-1, keepdims=True)
    mx = jnp.max(x, axis=-1, keepdims=True)
    _store_pooled(0.5 * avg + 0.5 * mx, o_ref)


def _catavgmax_kernel(x_ref, avg_ref, max_ref):
    x = x_ref[...].astype(jnp.float32)
    _store_pooled(jnp.mean(x, axis=-1, keepdims=True), avg_ref)
    _store_pooled(jnp.max(x, axis=-1, keepdims=True), max_ref)


_KERNELS = {
    "avg": (_avg_kernel, 1),
    "max": (_max_kernel, 1),
    "avgmax": (_avgmax_kernel, 1),
    "catavgmax": (_catavgmax_kernel, 2),
}


@functools.lru_cache(maxsize=None)
def _lane_dense_supported() -> bool:
    """Probe-compile the lane-dense epilogue once; fall back if it won't lower."""
    try:
        rows, hw = 256, 128
        x = jax.lax.broadcasted_iota(jnp.float32, (rows, hw), 0)  # row i == i
        out = pl.pallas_call(
            _avg_kernel,
            out_shape=jax.ShapeDtypeStruct((1, 1, rows), jnp.float32),
            grid_spec=pltpu.PrefetchScalarGridSpec(
                num_scalar_prefetch=0,
                grid=(1,),
                in_specs=[pl.BlockSpec((rows, hw), lambda r: (r, 0))],
                out_specs=pl.BlockSpec((1, 1, rows), lambda r: (r, 0, 0)),
            ),
        )(x)
        return bool(np.allclose(np.asarray(out).reshape(-1),
                                np.arange(rows, dtype=np.float32), atol=1e-5))
    except Exception:
        return False


def _choose_row_tile(nc: int, per_row_bytes: int, sublane: int, target_bytes: int) -> int:
    """Rows per grid step: ~target_bytes per buffer, >= _MIN_GRID_STEPS steps,
    rounded to the dtype's native sublane packing."""
    budget = max(1, target_bytes // per_row_bytes)
    depth = _cdiv(nc, _MIN_GRID_STEPS)
    rows = min(budget, depth, _MAX_ROW_TILE, nc)
    return _round_up(max(rows, 1), sublane)


def _pooled_rows(x2d, mode: str):
    """x2d: (N*C, HW) -> one (N*C,) array (or an (avg, max) pair for catavgmax)."""
    nc, hw = x2d.shape
    dtype = x2d.dtype
    itemsize = jnp.dtype(dtype).itemsize
    sublane = _sublane(dtype)
    kernel, n_out = _KERNELS[mode]
    target_bytes, vmem_limit = _tuning()
    lane_dense = _lane_dense_supported()

    # Per-row VMEM cost of one (input + output) buffer copy; Pallas double-buffers.
    in_row_bytes = _round_up(hw, 128) * itemsize
    out_row_bytes = (8 if lane_dense else 128) * itemsize * n_out
    r_tile = _choose_row_tile(nc, in_row_bytes + out_row_bytes, sublane, target_bytes)
    num_tiles = _cdiv(nc, r_tile)
    # TODO(synk): for small non-128-aligned HW (e.g. 7x7=49) pack G rows per
    # lane-dense input row and do a segmented reduce to restore full DMA density.
    # TODO(synk): if a single row ever exceeded the VMEM budget (HW in the
    # millions -- not a realistic pooling head), add an "arbitrary" HW grid axis
    # with running sum/max accumulators and 0 / -inf masking of pad lanes.

    if lane_dense:
        out_sds = jax.ShapeDtypeStruct((num_tiles, 1, r_tile), dtype)
        out_block = pl.BlockSpec((1, 1, r_tile), lambda r: (r, 0, 0))
    else:
        out_sds = jax.ShapeDtypeStruct((nc, 1), dtype)
        out_block = pl.BlockSpec((r_tile, 1), lambda r: (r, 0))
    out_shape = out_sds if n_out == 1 else (out_sds,) * 2
    out_specs = out_block if n_out == 1 else (out_block,) * 2

    cost = pl.CostEstimate(
        flops=(2 if (n_out == 2 or mode == "avgmax") else 1) * nc * hw,
        transcendentals=0,
        bytes_accessed=nc * hw * itemsize + n_out * nc * itemsize,
    )

    out = pl.pallas_call(
        kernel,
        out_shape=out_shape,
        grid_spec=pltpu.PrefetchScalarGridSpec(
            num_scalar_prefetch=0,
            grid=(num_tiles,),
            in_specs=[pl.BlockSpec((r_tile, hw), lambda r: (r, 0))],
            out_specs=out_specs,
        ),
        compiler_params=pltpu.CompilerParams(
            dimension_semantics=("parallel",),
            vmem_limit_bytes=vmem_limit,
        ),
        cost_estimate=cost,
    )(x2d)

    if n_out == 1:
        return out.reshape(-1)[:nc]
    return tuple(o.reshape(-1)[:nc] for o in out)


def select_adaptive_pool2d(x, pool_type: str = "fast", flatten: bool = False):
    """JAX/Pallas equivalent of timm SelectAdaptivePool2d.forward (NCHW input).

    Supports pool_type in {'', 'fast', 'fastavg', 'avg', 'fastmax', 'max',
    'fastavgmax', 'avgmax', 'fastcatavgmax', 'catavgmax'} with output_size=1.
    """
    # TODO(synk): output_size > 1 adaptive pooling grids and NHWC input_fmt are
    # not implemented; timm's 'fast' paths require output_size == 1 / NCHW here.
    if not pool_type:
        # nn.Identity pool; optional nn.Flatten(1)
        return x.reshape(x.shape[0], -1) if flatten else x

    n, c, h, w = x.shape
    x2d = x.reshape(n * c, h * w)  # contiguous dim-merge: layout no-op

    if pool_type.endswith("catavgmax"):
        avg, mx = _pooled_rows(x2d, "catavgmax")
        out = jnp.concatenate([avg.reshape(n, c), mx.reshape(n, c)], axis=1)  # (N, 2C)
    elif pool_type.endswith("avgmax"):
        out = _pooled_rows(x2d, "avgmax").reshape(n, c)
    elif pool_type.endswith("max"):
        out = _pooled_rows(x2d, "max").reshape(n, c)
    else:  # 'fast', 'fastavg', 'avg'
        out = _pooled_rows(x2d, "avg").reshape(n, c)

    if not flatten:
        out = out[:, :, None, None]  # keepdim -> (N, C', 1, 1)
    return out


if __name__ == "__main__":
    key = jax.random.PRNGKey(0)
    x = jax.random.normal(key, (2, 4, 16, 16), dtype=jnp.float32)

    # Pure-JAX references
    ref_avg = jnp.mean(x, axis=(2, 3))
    ref_max = jnp.max(x, axis=(2, 3))

    # Default config of SelectAdaptivePool2d: pool_type='fast', flatten=False
    out_fast = jax.block_until_ready(select_adaptive_pool2d(x, "fast", False))
    assert out_fast.shape == (2, 4, 1, 1)
    assert jnp.allclose(out_fast[:, :, 0, 0], ref_avg, atol=1e-5)

    out_max = jax.block_until_ready(select_adaptive_pool2d(x, "fastmax", True))
    assert out_max.shape == (2, 4)
    assert jnp.allclose(out_max, ref_max, atol=1e-5)

    out_avgmax = jax.block_until_ready(select_adaptive_pool2d(x, "avgmax", False))
    assert out_avgmax.shape == (2, 4, 1, 1)
    assert jnp.allclose(out_avgmax[:, :, 0, 0], 0.5 * (ref_avg + ref_max), atol=1e-5)

    out_cat = jax.block_until_ready(select_adaptive_pool2d(x, "catavgmax", True))
    assert out_cat.shape == (2, 8)
    assert jnp.allclose(out_cat, jnp.concatenate([ref_avg, ref_max], axis=1), atol=1e-5)

    out_id = jax.block_until_ready(select_adaptive_pool2d(x, "", False))
    assert out_id.shape == x.shape

    # Multi-tile grid: N*C = 1536 rows -> >= 8 grid steps.
    x2 = jax.random.normal(jax.random.PRNGKey(1), (3, 512, 32, 32), dtype=jnp.float32)
    ref2 = jnp.concatenate([jnp.mean(x2, axis=(2, 3)), jnp.max(x2, axis=(2, 3))], axis=1)
    out2 = jax.block_until_ready(select_adaptive_pool2d(x2, "catavgmax", True))
    assert out2.shape == (3, 1024)
    assert jnp.allclose(out2, ref2, atol=1e-5)

    # Partial final row block: N*C = 600 is not a multiple of the row tile, so the
    # last block over-reads garbage rows that must be masked/sliced away.
    x3 = jax.random.normal(jax.random.PRNGKey(2), (2, 300, 16, 16), dtype=jnp.float32)
    out3 = jax.block_until_ready(select_adaptive_pool2d(x3, "fastavg", True))
    assert out3.shape == (2, 300)
    assert jnp.allclose(out3, jnp.mean(x3, axis=(2, 3)), atol=1e-5)

    # bfloat16 path: 16-row sublane packing, float32 accumulation.
    x4 = jax.random.normal(jax.random.PRNGKey(3), (2, 8, 16, 16), dtype=jnp.bfloat16)
    x4f = x4.astype(jnp.float32)
    ref4 = 0.5 * (jnp.mean(x4f, axis=(2, 3)) + jnp.max(x4f, axis=(2, 3)))
    out4 = jax.block_until_ready(select_adaptive_pool2d(x4, "fastavgmax", True))
    assert out4.shape == (2, 8)
    assert jnp.allclose(out4.astype(jnp.float32), ref4, atol=2e-2)

    print("KERNEL_OK")
</pallas_src>

<mosaic_0001>
module attributes {stable_mosaic.version = 11 : i64} {
  func.func @_avg_kernel(%arg0: i32, %arg1: memref<256x128xf32, #tpu.memory_space<vmem>>, %arg2: memref<1x1x256xf32, #tpu.memory_space<vmem>>) attributes {dimension_semantics = [#tpu.dimension_semantics<arbitrary>], iteration_bounds = array<i64: 1>, scalar_prefetch = 0 : i64, scratch_operands = 0 : i64, tpu.core_type = #tpu.core_type<tc>, window_params = [{transform_indices = @transform_0, window_bounds = array<i64: 256, 128>}, {transform_indices = @transform_1, window_bounds = array<i64: 1, 1, 256>}]} {
    %c0 = arith.constant 0 : index
    %c0_0 = arith.constant 0 : index
    %0 = vector.load %arg1[%c0, %c0_0] : memref<256x128xf32, #tpu.memory_space<vmem>>, vector<256x128xf32>
    %cst = arith.constant dense<0.000000e+00> : vector<256xf32>
    %1 = vector.multi_reduction <add>, %0, %cst [1] : vector<256x128xf32> to vector<256xf32>
    %2 = vector.shape_cast %1 : vector<256xf32> to vector<256x1xf32>
    %cst_1 = arith.constant 1.280000e+02 : f32
    %3 = vector.broadcast %cst_1 : f32 to vector<256x1xf32>
    %4 = arith.divf %2, %3 : vector<256x1xf32>
    %5 = tpu.transpose %4, [1, 0] : vector<256x1xf32> -> vector<1x256xf32>
    %6 = vector.shape_cast %5 : vector<1x256xf32> to vector<1x1x256xf32>
    %c0_2 = arith.constant 0 : index
    %c0_3 = arith.constant 0 : index
    %c0_4 = arith.constant 0 : index
    %7 = vector.load %arg2[%c0_2, %c0_3, %c0_4] : memref<1x1x256xf32, #tpu.memory_space<vmem>>, vector<1x1x256xf32>
    tpu.vector_store %arg2[%c0_2, %c0_3, %c0_4], %6 {strides = array<i32>} : memref<1x1x256xf32, #tpu.memory_space<vmem>>, vector<1x1x256xf32>,
    return
  }
  func.func @transform_0(%arg0: i32) -> (i32, i32) {
    %c0_i32 = arith.constant 0 : i32
    %c0_i32_0 = arith.constant 0 : i32
    return %arg0, %c0_i32 : i32, i32
  }
  func.func @transform_1(%arg0: i32) -> (i32, i32, i32) {
    %c0_i32 = arith.constant 0 : i32
    %c0_i32_0 = arith.constant 0 : i32
    %c0_i32_1 = arith.constant 0 : i32
    return %arg0, %c0_i32, %c0_i32_0 : i32, i32, i32
  }
}

module attributes {stable_mosaic.version = 11 : i64} {
  func.func @_avg_kernel(%arg0: i32, %arg1: memref<8x256xf32, #tpu.memory_space<vmem>>, %arg2: memref<8x1xf32, #tpu.memory_space<vmem>>) attributes {dimension_semantics = [#tpu.dimension_semantics<parallel>], iteration_bounds = array<i64: 1>, scalar_prefetch = 0 : i64, scratch_operands = 0 : i64, tpu.core_type = #tpu.core_type<tc>, window_params = [{transform_indices = @transform_0, window_bounds = array<i64: 8, 256>}, {transform_indices = @transform_1, window_bounds = array<i64: 8, 1>}]} {
    %c0 = arith.constant 0 : index
    %c0_0 = arith.constant 0 : index
    %0 = vector.load %arg1[%c0, %c0_0] : memref<8x256xf32, #tpu.memory_space<vmem>>, vector<8x256xf32>
    %cst = arith.constant dense<0.000000e+00> : vector<8xf32>
    %1 = vector.multi_reduction <add>, %0, %cst [1] : vector<8x256xf32> to vector<8xf32>
    %2 = vector.shape_cast %1 : vector<8xf32> to vector<8x1xf32>
    %cst_1 = arith.constant 2.560000e+02 : f32
    %3 = vector.broadcast %cst_1 : f32 to vector<8x1xf32>
    %4 = arith.divf %2, %3 : vector<8x1xf32>
    %c0_2 = arith.constant 0 : index
    %c0_3 = arith.constant 0 : index
    %5 = vector.load %arg2[%c0_2, %c0_3] : memref<8x1xf32, #tpu.memory_space<vmem>>, vector<8x1xf32>
    tpu.vector_store %arg2[%c0_2, %c0_3], %4 {strides = array<i32>} : memref<8x1xf32, #tpu.memory_space<vmem>>, vector<8x1xf32>,
    return
  }
  func.func @transform_0(%arg0: i32) -> (i32, i32) {
    %c0_i32 = arith.constant 0 : i32
    %c0_i32_0 = arith.constant 0 : i32
    return %arg0, %c0_i32 : i32, i32
  }
  func.func @transform_1(%arg0: i32) -> (i32, i32) {
    %c0_i32 = arith.constant 0 : i32
    %c0_i32_0 = arith.constant 0 : i32
    return %arg0, %c0_i32 : i32, i32
  }
}

</mosaic_0001>

<bundles_post_ra>
// kernel: tpu_custom_call.1
= control target key start
LH: loop header
LB: loop body
LE: loop exit
PB: predicated region body
PF: predicated region fallthrough
CT: control target
= control target key end

     0   :  { %6 = vsyncpa [#allocation3], 0  ;;  %s366_s0 = inlined_call_operand.hbm [shape: f32[256,128], index: 0, kind: input, shape index: {}]   ;;  %s367_s1 = inlined_call_operand.hbm [shape: f32[1,1,256], index: 1, kind: output, shape index: {}]  }
   0x1   :  { %7 = vsyncpa [#allocation4], 0  ;;  %s12_s8 = sshll.u32 %s366_s0, 4  ;;  %s311_s9 = smov [#allocation2]   ;;  %s13_s8 = int_to_ptr.hbm [resolvable:$true] %s12_s8 }
   0x2   :  { %s14_s10 = sshll.u32 %s311_s9, 4  ;;  %s312_s11 = smov 128   ;;  %s15_s10 = int_to_ptr.vmem [resolvable:$true] %s14_s10 }
   0x3   :  { %s313_s12 = smov 8  }
   0x4   :  { %20 = dma.hbm_to_vmem [thread:$0]  %s13_s8, 4096, %s15_s10, [#allocation3], %s312_s11, %s312_s11, %s313_s12  }
   0x5   :  { %307 = dma.done.wait [#allocation3], 4096  }
   0x6   :  { %308 = vsyncadd [#allocation3], 4294963200  ;;  %v27_v0 = vld [vmem:[#allocation2 + $0x10] sm:$0xff]  ;;  %v25_v1 = vld [vmem:[#allocation2] sm:$0xff]  ;;  %v314_v30 = vmov 128.0   ;;  %s315_s0 = smov [#allocation5]  }
   0x7   :  { %v29_v2 = vld [vmem:[#allocation2 + $0x20] sm:$0xff]  ;;  %61 = vadd.xlane.f32.xlu1 %v27_v0  ;;  %57 = vadd.xlane.f32.xlu0 %v25_v1  ;;  %v28_v3 = vld [vmem:[#allocation2 + $0x18] sm:$0xff]  ;;  %v26_v4 = vld [vmem:[#allocation2 + $0x8] sm:$0xff]  ;;  %257 = vrcp.f32 %v314_v30  ;;  %s240_s13 = sshll.u32 %s315_s0, 4  ;;  %s242_s16 = sshll.u32 %s367_s1, 4  ;;  %vm227_vm1 = vcmask 1040384   ;;  %s241_s13 = int_to_ptr.vmem [resolvable:$true] %s240_s13  ;;  %s243_s16 = int_to_ptr.hbm [resolvable:$true] %s242_s16 }
   0x8   :  { %65 = vadd.xlane.f32.xlu2 %v29_v2  ;;  %v30_v5 = vld [vmem:[#allocation2 + $0x28] sm:$0xff]  ;;  %v32_v6 = vld [vmem:[#allocation2 + $0x38] sm:$0xff]  ;;  %v31_v7 = vld [vmem:[#allocation2 + $0x30] sm:$0xff] }
   0x9   :  { %v33_v8 = vld [vmem:[#allocation2 + $0x40] sm:$0xff]  ;;  %v35_v9 = vld [vmem:[#allocation2 + $0x50] sm:$0xff]  ;;  %v34_v10 = vld [vmem:[#allocation2 + $0x48] sm:$0xff] }
   0xa   :  { %v36_v11 = vld [vmem:[#allocation2 + $0x58] sm:$0xff]  ;;  %v38_v12 = vld [vmem:[#allocation2 + $0x68] sm:$0xff]  ;;  %v37_v13 = vld [vmem:[#allocation2 + $0x60] sm:$0xff] }
   0xb   :  { %v39_v14 = vld [vmem:[#allocation2 + $0x70] sm:$0xff]  ;;  %v41_v15 = vld [vmem:[#allocation2 + $0x80] sm:$0xff]  ;;  %v40_v16 = vld [vmem:[#allocation2 + $0x78] sm:$0xff] }
   0xc   :  { %v42_v17 = vld [vmem:[#allocation2 + $0x88] sm:$0xff]  ;;  %v43_v18 = vld [vmem:[#allocation2 + $0x90] sm:$0xff]  ;;  %v44_v19 = vld [vmem:[#allocation2 + $0x98] sm:$0xff] }
   0xd   :  { %v45_v20 = vld [vmem:[#allocation2 + $0xa0] sm:$0xff]  ;;  %v46_v21 = vld [vmem:[#allocation2 + $0xa8] sm:$0xff]  ;;  %v47_v22 = vld [vmem:[#allocation2 + $0xb0] sm:$0xff]  ;;  %v258_v31 = vpop.eup %257 }
   0xe   :  { %v48_v23 = vld [vmem:[#allocation2 + $0xb8] sm:$0xff]  ;;  %v49_v24 = vld [vmem:[#allocation2 + $0xc0] sm:$0xff]  ;;  %v50_v25 = vld [vmem:[#allocation2 + $0xc8] sm:$0xff]  ;;  %v122_v32 = vmul.f32 128.0, %v258_v31  ;;  %vm126_vm0 = vweird.f32 %v258_v31 }
   0xf   :  { %63 = vadd.xlane.f32.xlu1 %v28_v3  ;;  %59 = vadd.xlane.f32.xlu0 %v26_v4  ;;  %v51_v26 = vld [vmem:[#allocation2 + $0xd0] sm:$0xff]  ;;  %v52_v27 = vld [vmem:[#allocation2 + $0xd8] sm:$0xff]  ;;  %v54_v28 = vld [vmem:[#allocation2 + $0xe8] sm:$0xff] }
  0x10   :  { %67 = vadd.xlane.f32.xlu2 %v30_v5  ;;  %v55_v29 = vld [vmem:[#allocation2 + $0xf0] sm:$0xff]  ;;  %v123_v33 = vsub.f32 1.0, %v122_v32  ;;  %v53_v34 = vld [vmem:[#allocation2 + $0xe0] sm:$0xff]  ;;  %v56_v46 = vld [vmem:[#allocation2 + $0xf8] sm:$0xff] }
  0x12   :  { %v124_v35 = vmul.f32 %v258_v31, %v123_v33 }
  0x14   :  { %v125_v36 = vadd.f32 %v258_v31, %v124_v35 }
  0x16   :  { %v329_v37 = vsel %vm126_vm0, %v258_v31, %v125_v36 }
  0x17   :  { %71 = vadd.xlane.f32.xlu1 %v32_v6  ;;  %69 = vadd.xlane.f32.xlu0 %v31_v7 }
  0x18   :  { %73 = vadd.xlane.f32.xlu2 %v33_v8 }
  0x1f   :  { %77 = vadd.xlane.f32.xlu1 %v35_v9  ;;  %75 = vadd.xlane.f32.xlu0 %v34_v10 }
  0x20   :  { %79 = vadd.xlane.f32.xlu2 %v36_v11 }
  0x27   :  { %83 = vadd.xlane.f32.xlu1 %v38_v12  ;;  %81 = vadd.xlane.f32.xlu0 %v37_v13 }
  0x28   :  { %85 = vadd.xlane.f32.xlu2 %v39_v14 }
  0x2f   :  { %89 = vadd.xlane.f32.xlu1 %v41_v15  ;;  %87 = vadd.xlane.f32.xlu0 %v40_v16 }
  0x30   :  { %91 = vadd.xlane.f32.xlu2 %v42_v17 }
  0x37   :  { %93 = vadd.xlane.f32.xlu0 %v43_v18  ;;  %95 = vadd.xlane.f32.xlu1 %v44_v19 }
  0x38   :  { %97 = vadd.xlane.f32.xlu2 %v45_v20 }
  0x3f   :  { %99 = vadd.xlane.f32.xlu0 %v46_v21  ;;  %101 = vadd.xlane.f32.xlu1 %v47_v22 }
  0x40   :  { %103 = vadd.xlane.f32.xlu2 %v48_v23 }
  0x47   :  { %105 = vadd.xlane.f32.xlu0 %v49_v24  ;;  %107 = vadd.xlane.f32.xlu1 %v50_v25 }
  0x48   :  { %109 = vadd.xlane.f32.xlu2 %v51_v26 }
  0x4f   :  { %111 = vadd.xlane.f32.xlu0 %v52_v27  ;;  %113 = vadd.xlane.f32.xlu1 %v53_v34 }
  0x50   :  { %115 = vadd.xlane.f32.xlu2 %v54_v28 }
  0x57   :  { %117 = vadd.xlane.f32.xlu0 %v55_v29  ;;  %119 = vadd.xlane.f32.xlu1 %v56_v46 }
  0x7a   :  { %v62_v38 = vpop.xlane.xlu1 %61  ;;  %v58_v39 = vpop.xlane.xlu0 %57 }
  0x7b   :  { %v128_v40 = vmul.f32 %v329_v37, %v58_v39  ;;  %v66_v41 = vpop.xlane.xlu2 %65  ;;  %v130_v49 = vmul.f32 %v329_v37, %v62_v38 }
  0x7c   :  { %v132_v57 = vmul.f32 %v329_v37, %v66_v41 }
  0x7d   :  { %160 = vxpose.xlu2.b32.start [1/16] (narrow) %v128_v40, 8  ;;  %v230_v40 = vlaneseq }
  0x7f   :  { %vm232_vm2 = vcmp.lt.s32.totalorder %v230_v40, 256 }
  0x82   :  { %v64_v42 = vpop.xlane.xlu1 %63  ;;  %v60_v43 = vpop.xlane.xlu0 %59 }
  0x83   :  { %v129_v44 = vmul.f32 %v329_v37, %v60_v43  ;;  %v68_v45 = vpop.xlane.xlu2 %67  ;;  %v131_v53 = vmul.f32 %v329_v37, %v64_v42 }
  0x84   :  { %v133_v60 = vmul.f32 %v329_v37, %v68_v45 }
  0x85   :  { %161 = vxpose.xlu2.b32.cont [2/16] (narrow) %v129_v44, 8 }
  0x8a   :  { %v72_v47 = vpop.xlane.xlu1 %71  ;;  %v70_v48 = vpop.xlane.xlu0 %69 }
  0x8b   :  { %v74_v50 = vpop.xlane.xlu2 %73  ;;  %v134_v1 = vmul.f32 %v329_v37, %v70_v48  ;;  %v135_v4 = vmul.f32 %v329_v37, %v72_v47 }
  0x8c   :  { %v136_v7 = vmul.f32 %v329_v37, %v74_v50 }
  0x8d   :  { %162 = vxpose.xlu2.b32.cont [3/16] (narrow) %v130_v49, 8 }
  0x92   :  { %v78_v51 = vpop.xlane.xlu1 %77  ;;  %v76_v52 = vpop.xlane.xlu0 %75 }
  0x93   :  { %v80_v54 = vpop.xlane.xlu2 %79  ;;  %v137_v10 = vmul.f32 %v329_v37, %v76_v52  ;;  %v138_v13 = vmul.f32 %v329_v37, %v78_v51 }
  0x94   :  { %v139_v16 = vmul.f32 %v329_v37, %v80_v54 }
  0x95   :  { %163 = vxpose.xlu2.b32.cont [4/16] (narrow) %v131_v53, 8 }
  0x9a   :  { %v84_v55 = vpop.xlane.xlu1 %83  ;;  %v82_v56 = vpop.xlane.xlu0 %81 }
  0x9b   :  { %v86_v58 = vpop.xlane.xlu2 %85  ;;  %v140_v19 = vmul.f32 %v329_v37, %v82_v56  ;;  %v141_v21 = vmul.f32 %v329_v37, %v84_v55 }
  0x9c   :  { %v142_v25 = vmul.f32 %v329_v37, %v86_v58 }
  0x9d   :  { %164 = vxpose.xlu2.b32.cont [5/16] (narrow) %v132_v57, 8 }
  0xa2   :  { %v90_v59 = vpop.xlane.xlu1 %89  ;;  %v88_v62 = vpop.xlane.xlu0 %87 }
  0xa3   :  { %v144_v61 = vmul.f32 %v329_v37, %v90_v59  ;;  %v92_v63 = vpop.xlane.xlu2 %91  ;;  %v143_v28 = vmul.f32 %v329_v37, %v88_v62 }
  0xa4   :  { %v145_v0 = vmul.f32 %v329_v37, %v92_v63 }
  0xa5   :  { %192 = vxpose.xlu0.b32.start [1/16] (narrow) %v144_v61, 8  ;;  %165 = vxpose.xlu2.b32.cont [6/16] (narrow) %v133_v60, 8 }
  0xaa   :  { %v94_v2 = vpop.xlane.xlu0 %93  ;;  %v96_v5 = vpop.xlane.xlu1 %95 }
  0xab   :  { %v146_v3 = vmul.f32 %v329_v37, %v94_v2  ;;  %v147_v6 = vmul.f32 %v329_v37, %v96_v5  ;;  %v98_v8 = vpop.xlane.xlu2 %97 }
  0xac   :  { %v148_v9 = vmul.f32 %v329_v37, %v98_v8 }
  0xad   :  { %193 = vxpose.xlu0.b32.cont [2/16] (narrow) %v145_v0, 8  ;;  %166 = vxpose.xlu2.b32.cont [7/16] (narrow) %v134_v1, 8 }
  0xb2   :  { %v100_v11 = vpop.xlane.xlu0 %99  ;;  %v102_v14 = vpop.xlane.xlu1 %101 }
  0xb3   :  { %v149_v12 = vmul.f32 %v329_v37, %v100_v11  ;;  %v150_v15 = vmul.f32 %v329_v37, %v102_v14  ;;  %v104_v17 = vpop.xlane.xlu2 %103 }
  0xb4   :  { %v151_v18 = vmul.f32 %v329_v37, %v104_v17 }
  0xb5   :  { %167 = vxpose.xlu2.b32.cont [8/16] (narrow) %v135_v4, 8  ;;  %194 = vxpose.xlu0.b32.cont [3/16] (narrow) %v146_v3, 8 }
  0xba   :  { %v106_v20 = vpop.xlane.xlu0 %105  ;;  %v108_v23 = vpop.xlane.xlu1 %107 }
  0xbb   :  { %v152_v22 = vmul.f32 %v329_v37, %v106_v20  ;;  %v153_v24 = vmul.f32 %v329_v37, %v108_v23  ;;  %v110_v26 = vpop.xlane.xlu2 %109 }
  0xbc   :  { %v154_v27 = vmul.f32 %v329_v37, %v110_v26 }
  0xbd   :  { %168 = vxpose.xlu2.b32.cont [9/16] (narrow) %v136_v7, 8  ;;  %195 = vxpose.xlu0.b32.cont [4/16] (narrow) %v147_v6, 8 }
  0xc2   :  { %v112_v29 = vpop.xlane.xlu0 %111  ;;  %v114_v31 = vpop.xlane.xlu1 %113 }
  0xc3   :  { %v155_v30 = vmul.f32 %v329_v37, %v112_v29  ;;  %v156_v32 = vmul.f32 %v329_v37, %v114_v31  ;;  %v116_v33 = vpop.xlane.xlu2 %115 }
  0xc4   :  { %v157_v34 = vmul.f32 %v329_v37, %v116_v33 }
  0xc5   :  { %169 = vxpose.xlu2.b32.cont [10/16] (narrow) %v137_v10, 8  ;;  %196 = vxpose.xlu0.b32.cont [5/16] (narrow) %v148_v9, 8 }
  0xca   :  { %v118_v35 = vpop.xlane.xlu0 %117  ;;  %v120_v38 = vpop.xlane.xlu1 %119 }
  0xcb   :  { %v158_v36 = vmul.f32 %v329_v37, %v118_v35  ;;  %v159_v39 = vmul.f32 %v329_v37, %v120_v38 }
  0xcd   :  { %170 = vxpose.xlu2.b32.cont [11/16] (narrow) %v138_v13, 8  ;;  %197 = vxpose.xlu0.b32.cont [6/16] (narrow) %v149_v12, 8 }
  0xd5   :  { %171 = vxpose.xlu2.b32.cont [12/16] (narrow) %v139_v16, 8  ;;  %198 = vxpose.xlu0.b32.cont [7/16] (narrow) %v150_v15, 8 }
  0xdd   :  { %172 = vxpose.xlu2.b32.cont [13/16] (narrow) %v140_v19, 8  ;;  %199 = vxpose.xlu0.b32.cont [8/16] (narrow) %v151_v18, 8 }
  0xe5   :  { %173 = vxpose.xlu2.b32.cont [14/16] (narrow) %v141_v21, 8  ;;  %200 = vxpose.xlu0.b32.cont [9/16] (narrow) %v152_v22, 8 }
  0xed   :  { %174 = vxpose.xlu2.b32.cont [15/16] (narrow) %v142_v25, 8  ;;  %201 = vxpose.xlu0.b32.cont [10/16] (narrow) %v153_v24, 8 }
  0xf5   :  { %175 = vxpose.xlu2.b32.end [16/16] (narrow) %v143_v28, 8  ;;  %202 = vxpose.xlu0.b32.cont [11/16] (narrow) %v154_v27, 8 }
  0xfd   :  { %203 = vxpose.xlu0.b32.cont [12/16] (narrow) %v155_v30, 8 }
 0x105   :  { %204 = vxpose.xlu0.b32.cont [13/16] (narrow) %v156_v32, 8 }
 0x10d   :  { %205 = vxpose.xlu0.b32.cont [14/16] (narrow) %v157_v34, 8 }
 0x115   :  { %206 = vxpose.xlu0.b32.cont [15/16] (narrow) %v158_v36, 8 }
 0x116   :  { %v176_v42 = vpop.trf.xlu2 }
 0x11d   :  { %207 = vxpose.xlu0.b32.end [16/16] (narrow) %v159_v39, 8 }
 0x149   :  { %v208_v41 = vpop.trf.xlu0 }
 0x14a   :  { %v226_v43 = vrot.slane %v208_v41, 7 }
 0x14c   :  { %v228_v44 = vsel %vm227_vm1, %v176_v42, %v226_v43 }
 0x14d   :  { %234 = vst.msk [vmem:[#allocation5] sm:$0x3] %vm232_vm2, %v228_v44 }
 0x14e   :  { %245 = dma.vmem_to_hbm [thread:$0]  %s241_s13, 32, %s243_s16, [#allocation4]  }
 0x14f   :  { %309 = dma.done.wait [#allocation4], 32  }
 0x150   :  { %310 = vsyncadd [#allocation4], 4294967264 }
 0x151   :  { %250 = vsyncpa [#allocation3], 1 }
 0x152   :  { %251 = vsyncpa [#allocation4], 1 }

// kernel: tpu_custom_call.1
= control target key start
LH: loop header
LB: loop body
LE: loop exit
PB: predicated region body
PF: predicated region fallthrough
CT: control target
= control target key end

     0   :  { %6 = vsyncpa [#allocation3], 0  ;;  %s72_s9 = smov [#allocation2]   ;;  %s90_s0 = inlined_call_operand.hbm [shape: f32[8,256], index: 0, kind: input, shape index: {}]   ;;  %s91_s1 = inlined_call_operand.vmem [shape: f32[8,1], index: 1, kind: output, shape index: {}]  }
   0x1   :  { %s12_s8 = sshll.u32 %s90_s0, 4  ;;  %s14_s10 = sshll.u32 %s72_s9, 4  ;;  %s13_s8 = int_to_ptr.hbm [resolvable:$true] %s12_s8  ;;  %s15_s10 = int_to_ptr.vmem [resolvable:$true] %s14_s10 }
   0x2   :  { %17 = dma.hbm_to_vmem [thread:$0]  %s13_s8, 256, %s15_s10, [#allocation3]  }
   0x3   :  { %70 = dma.done.wait [#allocation3], 256  }
   0x4   :  { %71 = vsyncadd [#allocation3], 4294967040  ;;  %v22_v0 = vld [vmem:[#allocation2] sm:$0xff]  ;;  %v23_v1 = vld [vmem:[#allocation2 + $0x8] sm:$0xff]  ;;  %v73_v3 = vmov 256.0   ;;  %vm35_vm1 = vcmask 7168  }
   0x5   :  { %v24_v2 = vadd.f32 %v23_v1, %v22_v0  ;;  %44 = vrcp.f32 %v73_v3 }
   0x7   :  { %25 = vadd.xlane.f32.xlu0 %v24_v2 }
   0xb   :  { %v45_v4 = vpop.eup %44 }
   0xc   :  { %v28_v5 = vmul.f32 256.0, %v45_v4  ;;  %vm32_vm0 = vweird.f32 %v45_v4 }
   0xe   :  { %v29_v6 = vsub.f32 1.0, %v28_v5 }
  0x10   :  { %v30_v7 = vmul.f32 %v45_v4, %v29_v6 }
  0x12   :  { %v31_v8 = vadd.f32 %v45_v4, %v30_v7 }
  0x14   :  { %v33_v9 = vsel %vm32_vm0, %v45_v4, %v31_v8 }
  0x7a   :  { %v26_v10 = vpop.xlane.xlu0 %25 }
  0x7b   :  { %v34_v11 = vmul.f32 %v33_v9, %v26_v10 }
  0x7d   :  { %36 = vst.msk [vmem:[%s91_s1] sm:$0xff] %vm35_vm1, %v34_v11 }
  0x7e   :  { %41 = vsyncpa [#allocation3], 1 }

</bundles_post_ra>
